<compile_context>
chip_gen: v7x
topology: tpu7x:2x2x1
jax: 0.10.0
libtpu: 0.0.40
codegen_flags: <defaults>
</compile_context>

<pallas_src>
import functools

import jax
import jax.numpy as jnp
from jax.experimental import pallas as pl
from jax.experimental.pallas import tpu as pltpu


def _hardswish(x):
    # x * relu6(x + 3) / 6
    return x * jnp.clip(x + 3.0, 0.0, 6.0) * (1.0 / 6.0)


def _shift_lanes(y, off):
    """result[:, p] = y[:, p + off] if 0 <= p + off < HW else 0 (static off)."""
    if off == 0:
        return y
    c, hw = y.shape
    fill = jnp.zeros((c, abs(off)), y.dtype)
    if off > 0:
        return jnp.concatenate([y[:, off:], fill], axis=1)
    return jnp.concatenate([fill, y[:, :hw + off]], axis=1)


def _bottleneck_kernel(x_ref, w1_ref, b1_ref, w2_ref, b2_ref, o_ref,
                       *, H, W, add, matmul_dtype):
    # x_ref:  (1, C1, H*W)    input tile, channel-major, lanes = H*W
    # w1_ref: (C_p, C1)       1x1 conv weight with BN1 scale folded in
    #                         (hidden channels padded to C_p)
    # b1_ref: (C_p, 1)        folded BN1 bias (0 in padded rows)
    # w2_ref: (C2, 9*C_p)     3x3 conv weight, tap-major im2col layout,
    #                         BN2 scale folded in
    # b2_ref: (C2, 1)         folded BN2 bias
    # o_ref:  (1, C2, H*W)    output tile (lane-dense store)
    HW = H * W
    x = x_ref[0]                                        # (C1, HW) f32
    cp = w1_ref.shape[0]

    # ---- cv1: 1x1 conv == (C_p, C1) @ (C1, HW), then BN bias + Hardswish ----
    y1 = jnp.dot(w1_ref[...], x.astype(matmul_dtype),
                 preferred_element_type=jnp.float32)
    y1 = _hardswish(y1 + b1_ref[...])                   # (C_p, HW) f32
    # padded rows: hardswish(0 + 0) == 0, so they contribute nothing to cv2.

    # ---- cv2: 3x3 conv (pad=1) as ONE matmul over a 9-tap im2col ----
    # Build the im2col operand directly in the matmul dtype (halves vregs
    # when bf16).  lane p maps to (h, w) = (p // W, p % W).
    y1m = y1.astype(matmul_dtype)
    w_idx = jax.lax.broadcasted_iota(jnp.int32, (cp, HW), 1) % W
    not_first_col = w_idx != 0
    not_last_col = w_idx != (W - 1)

    taps = []
    for idx in range(9):                                # static, unrolled
        dy, dx = idx // 3 - 1, idx % 3 - 1
        t = _shift_lanes(y1m, dy * W + dx)              # row bounds via 0-fill
        if dx == -1:
            t = jnp.where(not_first_col, t, jnp.zeros((), t.dtype))
        elif dx == 1:
            t = jnp.where(not_last_col, t, jnp.zeros((), t.dtype))
        taps.append(t)
    y_col = jnp.concatenate(taps, axis=0)               # (9*C_p, HW)

    y2 = jnp.dot(w2_ref[...], y_col,
                 preferred_element_type=jnp.float32)    # (C2, HW) f32
    y2 = _hardswish(y2 + b2_ref[...])
    if add:
        y2 = y2 + x                                      # shortcut (c1 == c2)
    o_ref[0] = y2.astype(o_ref.dtype)


def bottleneck_pallas(x_nchw, params, shortcut=True, matmul_dtype=jnp.float32):
    """Bottleneck forward. x_nchw: (N, C1, H, W) float32 (PyTorch layout)."""
    w1, b1, w2, b2 = params
    N, C1, H, W = x_nchw.shape
    HW = H * W
    C_p = w1.shape[0]
    C2 = w2.shape[0]
    add = shortcut and (C1 == C2)

    x3 = x_nchw.reshape(N, C1, HW)          # free reshape — no NCHW<->NHWC transpose
    w1_m = w1.astype(matmul_dtype)          # MXU operands (bf16 on v6e/v7x)
    w2_m = w2.astype(matmul_dtype)

    kernel = functools.partial(_bottleneck_kernel, H=H, W=W, add=add,
                               matmul_dtype=matmul_dtype)

    out3 = pl.pallas_call(
        kernel,
        out_shape=jax.ShapeDtypeStruct((N, C2, HW), x_nchw.dtype),
        grid_spec=pltpu.PrefetchScalarGridSpec(
            num_scalar_prefetch=0,
            grid=(N,),
            in_specs=[
                pl.BlockSpec((1, C1, HW), lambda n: (n, 0, 0)),
                pl.BlockSpec((C_p, C1), lambda n: (0, 0)),
                pl.BlockSpec((C_p, 1), lambda n: (0, 0)),
                pl.BlockSpec((C2, 9 * C_p), lambda n: (0, 0)),
                pl.BlockSpec((C2, 1), lambda n: (0, 0)),
            ],
            out_specs=pl.BlockSpec((1, C2, HW), lambda n: (n, 0, 0)),
        ),
        compiler_params=pltpu.CompilerParams(
            dimension_semantics=("parallel",)),
        # For realistic YOLO sizes: add an H-strip grid axis (1-row halo) and
        # set vmem_limit_bytes so 2*(in+out)+scratch fits v7x's 64 MiB VMEM.
    )(x3, w1_m, b1, w2_m, b2)

    return out3.reshape(N, C2, H, W)


def make_params(key, c1, c2, e=0.5, eps=1e-5):
    """Deterministic synthetic weights matching nn.Conv2d/BatchNorm2d shapes."""
    c_ = int(c2 * e)
    c_p = ((c_ + 7) // 8) * 8               # pad hidden channels to sublane multiple
    ks = jax.random.split(key, 10)
    # conv weights in PyTorch OIHW layout
    w1_oihw = 0.1 * jax.random.normal(ks[0], (c_, c1, 1, 1), jnp.float32)
    w2_oihw = 0.1 * jax.random.normal(ks[1], (c2, c_, 3, 3), jnp.float32)
    # BatchNorm params / running stats (eval mode -> fold into scale/bias)
    g1 = 1.0 + 0.1 * jax.random.normal(ks[2], (c_,), jnp.float32)
    be1 = 0.1 * jax.random.normal(ks[3], (c_,), jnp.float32)
    m1 = 0.1 * jax.random.normal(ks[4], (c_,), jnp.float32)
    v1 = 0.5 + jnp.abs(jax.random.normal(ks[5], (c_,), jnp.float32))
    g2 = 1.0 + 0.1 * jax.random.normal(ks[6], (c2,), jnp.float32)
    be2 = 0.1 * jax.random.normal(ks[7], (c2,), jnp.float32)
    m2 = 0.1 * jax.random.normal(ks[8], (c2,), jnp.float32)
    v2 = 0.5 + jnp.abs(jax.random.normal(ks[9], (c2,), jnp.float32))

    s1 = g1 / jnp.sqrt(v1 + eps)
    b1 = be1 - m1 * s1
    s2 = g2 / jnp.sqrt(v2 + eps)
    b2 = be2 - m2 * s2

    # Kernel layouts (channel-major).  BN scales are folded into the conv
    # weights so the kernel only needs a bias-add.  Padded hidden channels
    # carry zero weights / bias, so they contribute exactly nothing.
    w1_fold = w1_oihw[:, :, 0, 0] * s1[:, None]                 # (c_, c1)
    w1_k = jnp.zeros((c_p, c1), jnp.float32).at[:c_].set(w1_fold)
    b1_k = jnp.zeros((c_p, 1), jnp.float32).at[:c_, 0].set(b1)
    w2_fold = w2_oihw * s2[:, None, None, None]                 # (c2, c_, 3, 3)
    w2_pad = jnp.zeros((c2, c_p, 3, 3), jnp.float32).at[:, :c_].set(w2_fold)
    # (C2, ky, kx, C_p) -> (C2, 9*C_p); row order matches the kernel's taps.
    w2_k = jnp.transpose(w2_pad, (0, 2, 3, 1)).reshape(c2, 9 * c_p)
    b2_k = b2[:, None]

    params = (w1_k, b1_k, w2_k, b2_k)
    raw = (w1_oihw, w2_oihw, s1, b1, s2, b2)
    return params, raw


def bottleneck_ref(x_nchw, raw, shortcut=True):
    """Pure-JAX reference (NCHW, matching PyTorch eval-mode semantics)."""
    w1_oihw, w2_oihw, s1, b1, s2, b2 = raw
    dn = ("NCHW", "OIHW", "NCHW")
    y = jax.lax.conv_general_dilated(x_nchw, w1_oihw, (1, 1),
                                     [(0, 0), (0, 0)], dimension_numbers=dn)
    y = y * s1[None, :, None, None] + b1[None, :, None, None]
    y = _hardswish(y)
    y = jax.lax.conv_general_dilated(y, w2_oihw, (1, 1),
                                     [(1, 1), (1, 1)], dimension_numbers=dn)
    y = y * s2[None, :, None, None] + b2[None, :, None, None]
    y = _hardswish(y)
    if shortcut and x_nchw.shape[1] == y.shape[1]:
        y = y + x_nchw
    return y


# TODO(synk): autoShape's host-side preprocessing (PIL/letterbox, /255), NMS,
# scale_coords and the Detections container are dynamic-shape / host ops with
# no clean Pallas equivalent; only the model's dense Conv-BN-Hardswish
# bottleneck compute is implemented here.

if __name__ == "__main__":
    key = jax.random.PRNGKey(0)
    k_x, k_p = jax.random.split(key)

    N, C1, H, W = 2, 8, 16, 16
    C2 = 8                                  # c1 == c2 -> shortcut add active
    x = jax.random.normal(k_x, (N, C1, H, W), jnp.float32)

    params, raw = make_params(k_p, C1, C2, e=0.5)
    ref = bottleneck_ref(x, raw, shortcut=True)

    # f32 matmul path (v5e-friendly) — tight numerical check.
    out_f32 = jax.block_until_ready(
        bottleneck_pallas(x, params, shortcut=True, matmul_dtype=jnp.float32))
    assert out_f32.shape == (N, C2, H, W)
    assert jnp.allclose(out_f32, ref, atol=1e-3, rtol=1e-3), "f32 mismatch"

    # bf16 MXU-operand path (v6e/v7x peak) — accumulation stays f32,
    # tolerance loosened for bf16 operand rounding.
    out_bf16 = jax.block_until_ready(
        bottleneck_pallas(x, params, shortcut=True, matmul_dtype=jnp.bfloat16))
    assert out_bf16.shape == (N, C2, H, W)
    assert jnp.allclose(out_bf16, ref, atol=5e-2, rtol=5e-2), "bf16 mismatch"

    print("KERNEL_OK")
</pallas_src>

<mosaic_0001>
module attributes {stable_mosaic.version = 11 : i64} {
  func.func @_bottleneck_kernel(%arg0: i32, %arg1: memref<1x8x256xf32, #tpu.memory_space<vmem>>, %arg2: memref<8x8xf32, #tpu.memory_space<vmem>>, %arg3: memref<8x1xf32, #tpu.memory_space<vmem>>, %arg4: memref<8x72xf32, #tpu.memory_space<vmem>>, %arg5: memref<8x1xf32, #tpu.memory_space<vmem>>, %arg6: memref<1x8x256xf32, #tpu.memory_space<vmem>>) attributes {dimension_semantics = [#tpu.dimension_semantics<parallel>], iteration_bounds = array<i64: 2>, scalar_prefetch = 0 : i64, scratch_operands = 0 : i64, tpu.core_type = #tpu.core_type<tc>, window_params = [{transform_indices = @transform_0, window_bounds = array<i64: 1, 8, 256>}, {pipeline_mode = #tpu.pipeline_mode<synchronous>, transform_indices = @transform_1, window_bounds = array<i64: 8, 8>}, {pipeline_mode = #tpu.pipeline_mode<synchronous>, transform_indices = @transform_2, window_bounds = array<i64: 8, 1>}, {pipeline_mode = #tpu.pipeline_mode<synchronous>, transform_indices = @transform_3, window_bounds = array<i64: 8, 72>}, {pipeline_mode = #tpu.pipeline_mode<synchronous>, transform_indices = @transform_4, window_bounds = array<i64: 8, 1>}, {transform_indices = @transform_5, window_bounds = array<i64: 1, 8, 256>}]} {
    %c0 = arith.constant 0 : index
    %c0_0 = arith.constant 0 : index
    %c0_1 = arith.constant 0 : index
    %0 = vector.load %arg1[%c0, %c0_0, %c0_1] : memref<1x8x256xf32, #tpu.memory_space<vmem>>, vector<1x8x256xf32>
    %1 = vector.shape_cast %0 : vector<1x8x256xf32> to vector<8x256xf32>
    %c0_2 = arith.constant 0 : index
    %c0_3 = arith.constant 0 : index
    %2 = vector.load %arg2[%c0_2, %c0_3] : memref<8x8xf32, #tpu.memory_space<vmem>>, vector<8x8xf32>
    %cst = arith.constant dense<0.000000e+00> : vector<8x256xf32>
    %3 = tpu.matmul %2, %1, %cst {dimension_numbers = #tpu.dot_dimension_numbers<[1], [0], [0], [1], [0, 0, 1, 1], [], []>} : vector<8x8xf32>, vector<8x256xf32>, vector<8x256xf32> -> vector<8x256xf32>
    %c0_4 = arith.constant 0 : index
    %c0_5 = arith.constant 0 : index
    %4 = vector.load %arg3[%c0_4, %c0_5] : memref<8x1xf32, #tpu.memory_space<vmem>>, vector<8x1xf32>
    %5 = vector.broadcast %4 : vector<8x1xf32> to vector<8x256xf32>
    %6 = arith.addf %3, %5 : vector<8x256xf32>
    %cst_6 = arith.constant 3.000000e+00 : f32
    %7 = vector.broadcast %cst_6 : f32 to vector<8x256xf32>
    %8 = arith.addf %6, %7 : vector<8x256xf32>
    %cst_7 = arith.constant 0.000000e+00 : f32
    %cst_8 = arith.constant 6.000000e+00 : f32
    %9 = vector.broadcast %cst_7 : f32 to vector<8x256xf32>
    %10 = arith.maximumf %9, %8 : vector<8x256xf32>
    %11 = vector.broadcast %cst_8 : f32 to vector<8x256xf32>
    %12 = arith.minimumf %11, %10 : vector<8x256xf32>
    %13 = arith.mulf %6, %12 : vector<8x256xf32>
    %cst_9 = arith.constant 0.166666672 : f32
    %14 = vector.broadcast %cst_9 : f32 to vector<8x256xf32>
    %15 = arith.mulf %13, %14 : vector<8x256xf32>
    %16 = tpu.iota {dimensions = array<i32: 1>} : vector<8x256xi32>
    %c16_i32 = arith.constant 16 : i32
    %c0_i32 = arith.constant 0 : i32
    %17 = arith.cmpi eq, %c16_i32, %c0_i32 : i32
    %c1_i32 = arith.constant 1 : i32
    %18 = arith.select %17, %c1_i32, %c16_i32 : i32
    %19 = vector.broadcast %18 : i32 to vector<8x256xi32>
    %20 = arith.remsi %16, %19 : vector<8x256xi32>
    %c0_i32_10 = arith.constant 0 : i32
    %21 = vector.broadcast %c0_i32_10 : i32 to vector<8x256xi32>
    %22 = arith.cmpi ne, %20, %21 : vector<8x256xi32>
    %c0_i32_11 = arith.constant 0 : i32
    %23 = vector.broadcast %c0_i32_11 : i32 to vector<8x256xi32>
    %24 = arith.cmpi slt, %20, %23 : vector<8x256xi32>
    %c0_i32_12 = arith.constant 0 : i32
    %25 = arith.cmpi slt, %18, %c0_i32_12 : i32
    %26 = vector.broadcast %25 : i1 to vector<8x256xi1>
    %27 = vector.broadcast %26 : vector<8x256xi1> to vector<8x256xi1>
    %28 = arith.xori %24, %27 : vector<8x256xi1>
    %29 = arith.andi %28, %22 : vector<8x256xi1>
    %30 = vector.broadcast %18 : i32 to vector<8x256xi32>
    %31 = arith.addi %20, %30 : vector<8x256xi32>
    %32 = arith.select %29, %31, %20 : vector<8x256xi1>, vector<8x256xi32>
    %c0_i32_13 = arith.constant 0 : i32
    %33 = vector.broadcast %c0_i32_13 : i32 to vector<8x256xi32>
    %34 = arith.cmpi ne, %32, %33 : vector<8x256xi32>
    %c15_i32 = arith.constant 15 : i32
    %35 = vector.broadcast %c15_i32 : i32 to vector<8x256xi32>
    %36 = arith.cmpi ne, %32, %35 : vector<8x256xi32>
    %cst_14 = arith.constant 0.000000e+00 : f32
    %37 = vector.broadcast %cst_14 : f32 to vector<8x17xf32>
    %38 = vector.extract_strided_slice %15 {offsets = [0, 0], sizes = [8, 239], strides = [1, 1]} : vector<8x256xf32> to vector<8x239xf32>
    %39 = tpu.concatenate %37, %38 in 1 : vector<8x17xf32>, vector<8x239xf32> -> vector<8x256xf32>
    %cst_15 = arith.constant 0.000000e+00 : f32
    %40 = vector.broadcast %cst_15 : f32 to vector<8x256xf32>
    %41 = arith.select %34, %39, %40 : vector<8x256xi1>, vector<8x256xf32>
    %cst_16 = arith.constant 0.000000e+00 : f32
    %42 = vector.broadcast %cst_16 : f32 to vector<8x16xf32>
    %43 = vector.extract_strided_slice %15 {offsets = [0, 0], sizes = [8, 240], strides = [1, 1]} : vector<8x256xf32> to vector<8x240xf32>
    %44 = tpu.concatenate %42, %43 in 1 : vector<8x16xf32>, vector<8x240xf32> -> vector<8x256xf32>
    %cst_17 = arith.constant 0.000000e+00 : f32
    %45 = vector.broadcast %cst_17 : f32 to vector<8x15xf32>
    %46 = vector.extract_strided_slice %15 {offsets = [0, 0], sizes = [8, 241], strides = [1, 1]} : vector<8x256xf32> to vector<8x241xf32>
    %47 = tpu.concatenate %45, %46 in 1 : vector<8x15xf32>, vector<8x241xf32> -> vector<8x256xf32>
    %cst_18 = arith.constant 0.000000e+00 : f32
    %48 = vector.broadcast %cst_18 : f32 to vector<8x256xf32>
    %49 = arith.select %36, %47, %48 : vector<8x256xi1>, vector<8x256xf32>
    %cst_19 = arith.constant 0.000000e+00 : f32
    %50 = vector.broadcast %cst_19 : f32 to vector<8x1xf32>
    %51 = vector.extract_strided_slice %15 {offsets = [0, 0], sizes = [8, 255], strides = [1, 1]} : vector<8x256xf32> to vector<8x255xf32>
    %52 = tpu.concatenate %50, %51 in 1 : vector<8x1xf32>, vector<8x255xf32> -> vector<8x256xf32>
    %cst_20 = arith.constant 0.000000e+00 : f32
    %53 = vector.broadcast %cst_20 : f32 to vector<8x256xf32>
    %54 = arith.select %34, %52, %53 : vector<8x256xi1>, vector<8x256xf32>
    %cst_21 = arith.constant 0.000000e+00 : f32
    %55 = vector.broadcast %cst_21 : f32 to vector<8x1xf32>
    %56 = vector.extract_strided_slice %15 {offsets = [0, 1], sizes = [8, 255], strides = [1, 1]} : vector<8x256xf32> to vector<8x255xf32>
    %57 = tpu.concatenate %56, %55 in 1 : vector<8x255xf32>, vector<8x1xf32> -> vector<8x256xf32>
    %cst_22 = arith.constant 0.000000e+00 : f32
    %58 = vector.broadcast %cst_22 : f32 to vector<8x256xf32>
    %59 = arith.select %36, %57, %58 : vector<8x256xi1>, vector<8x256xf32>
    %cst_23 = arith.constant 0.000000e+00 : f32
    %60 = vector.broadcast %cst_23 : f32 to vector<8x15xf32>
    %61 = vector.extract_strided_slice %15 {offsets = [0, 15], sizes = [8, 241], strides = [1, 1]} : vector<8x256xf32> to vector<8x241xf32>
    %62 = tpu.concatenate %61, %60 in 1 : vector<8x241xf32>, vector<8x15xf32> -> vector<8x256xf32>
    %cst_24 = arith.constant 0.000000e+00 : f32
    %63 = vector.broadcast %cst_24 : f32 to vector<8x256xf32>
    %64 = arith.select %34, %62, %63 : vector<8x256xi1>, vector<8x256xf32>
    %cst_25 = arith.constant 0.000000e+00 : f32
    %65 = vector.broadcast %cst_25 : f32 to vector<8x16xf32>
    %66 = vector.extract_strided_slice %15 {offsets = [0, 16], sizes = [8, 240], strides = [1, 1]} : vector<8x256xf32> to vector<8x240xf32>
    %67 = tpu.concatenate %66, %65 in 1 : vector<8x240xf32>, vector<8x16xf32> -> vector<8x256xf32>
    %cst_26 = arith.constant 0.000000e+00 : f32
    %68 = vector.broadcast %cst_26 : f32 to vector<8x17xf32>
    %69 = vector.extract_strided_slice %15 {offsets = [0, 17], sizes = [8, 239], strides = [1, 1]} : vector<8x256xf32> to vector<8x239xf32>
    %70 = tpu.concatenate %69, %68 in 1 : vector<8x239xf32>, vector<8x17xf32> -> vector<8x256xf32>
    %cst_27 = arith.constant 0.000000e+00 : f32
    %71 = vector.broadcast %cst_27 : f32 to vector<8x256xf32>
    %72 = arith.select %36, %70, %71 : vector<8x256xi1>, vector<8x256xf32>
    %73 = tpu.concatenate %41, %44, %49, %54, %15, %59, %64, %67, %72 in 0 : vector<8x256xf32>, vector<8x256xf32>, vector<8x256xf32>, vector<8x256xf32>, vector<8x256xf32>, vector<8x256xf32>, vector<8x256xf32>, vector<8x256xf32>, vector<8x256xf32> -> vector<72x256xf32>
    %c0_28 = arith.constant 0 : index
    %c0_29 = arith.constant 0 : index
    %74 = vector.load %arg4[%c0_28, %c0_29] : memref<8x72xf32, #tpu.memory_space<vmem>>, vector<8x72xf32>
    %cst_30 = arith.constant dense<0.000000e+00> : vector<8x256xf32>
    %75 = tpu.matmul %74, %73, %cst_30 {dimension_numbers = #tpu.dot_dimension_numbers<[1], [0], [0], [1], [0, 0, 1, 1], [], []>} : vector<8x72xf32>, vector<72x256xf32>, vector<8x256xf32> -> vector<8x256xf32>
    %c0_31 = arith.constant 0 : index
    %c0_32 = arith.constant 0 : index
    %76 = vector.load %arg5[%c0_31, %c0_32] : memref<8x1xf32, #tpu.memory_space<vmem>>, vector<8x1xf32>
    %77 = vector.broadcast %76 : vector<8x1xf32> to vector<8x256xf32>
    %78 = arith.addf %75, %77 : vector<8x256xf32>
    %cst_33 = arith.constant 3.000000e+00 : f32
    %79 = vector.broadcast %cst_33 : f32 to vector<8x256xf32>
    %80 = arith.addf %78, %79 : vector<8x256xf32>
    %cst_34 = arith.constant 0.000000e+00 : f32
    %cst_35 = arith.constant 6.000000e+00 : f32
    %81 = vector.broadcast %cst_34 : f32 to vector<8x256xf32>
    %82 = arith.maximumf %81, %80 : vector<8x256xf32>
    %83 = vector.broadcast %cst_35 : f32 to vector<8x256xf32>
    %84 = arith.minimumf %83, %82 : vector<8x256xf32>
    %85 = arith.mulf %78, %84 : vector<8x256xf32>
    %cst_36 = arith.constant 0.166666672 : f32
    %86 = vector.broadcast %cst_36 : f32 to vector<8x256xf32>
    %87 = arith.mulf %85, %86 : vector<8x256xf32>
    %88 = arith.addf %87, %1 : vector<8x256xf32>
    %c0_37 = arith.constant 0 : index
    %c0_38 = arith.constant 0 : index
    %c0_39 = arith.constant 0 : index
    %89 = vector.load %arg6[%c0_37, %c0_38, %c0_39] : memref<1x8x256xf32, #tpu.memory_space<vmem>>, vector<1x8x256xf32>
    %90 = vector.shape_cast %89 : vector<1x8x256xf32> to vector<8x256xf32>
    %91 = vector.shape_cast %88 : vector<8x256xf32> to vector<1x8x256xf32>
    tpu.vector_store %arg6[%c0_37, %c0_38, %c0_39], %91 {strides = array<i32>} : memref<1x8x256xf32, #tpu.memory_space<vmem>>, vector<1x8x256xf32>,
    return
  }
  func.func @transform_0(%arg0: i32) -> (i32, i32, i32) {
    %c0_i32 = arith.constant 0 : i32
    %c0_i32_0 = arith.constant 0 : i32
    %c0_i32_1 = arith.constant 0 : i32
    return %arg0, %c0_i32, %c0_i32_0 : i32, i32, i32
  }
  func.func @transform_1(%arg0: i32) -> (i32, i32) {
    %c0_i32 = arith.constant 0 : i32
    %c0_i32_0 = arith.constant 0 : i32
    %c0_i32_1 = arith.constant 0 : i32
    return %c0_i32, %c0_i32_0 : i32, i32
  }
  func.func @transform_2(%arg0: i32) -> (i32, i32) {
    %c0_i32 = arith.constant 0 : i32
    %c0_i32_0 = arith.constant 0 : i32
    %c0_i32_1 = arith.constant 0 : i32
    return %c0_i32, %c0_i32_0 : i32, i32
  }
  func.func @transform_3(%arg0: i32) -> (i32, i32) {
    %c0_i32 = arith.constant 0 : i32
    %c0_i32_0 = arith.constant 0 : i32
    %c0_i32_1 = arith.constant 0 : i32
    return %c0_i32, %c0_i32_0 : i32, i32
  }
  func.func @transform_4(%arg0: i32) -> (i32, i32) {
    %c0_i32 = arith.constant 0 : i32
    %c0_i32_0 = arith.constant 0 : i32
    %c0_i32_1 = arith.constant 0 : i32
    return %c0_i32, %c0_i32_0 : i32, i32
  }
  func.func @transform_5(%arg0: i32) -> (i32, i32, i32) {
    %c0_i32 = arith.constant 0 : i32
    %c0_i32_0 = arith.constant 0 : i32
    %c0_i32_1 = arith.constant 0 : i32
    return %arg0, %c0_i32, %c0_i32_0 : i32, i32, i32
  }
}

</mosaic_0001>

<bundles_post_ra>
// kernel: tpu_custom_call.1
= control target key start
LH: loop header
LB: loop body
LE: loop exit
PB: predicated region body
PF: predicated region fallthrough
CT: control target
= control target key end

     0   :  { %10 = vsyncpa [#allocation3], 0  ;;  %s1177_s0 = inlined_call_operand.hbm [shape: f32[2,8,256], index: 0, kind: input, shape index: {}]   ;;  %s1178_s1 = inlined_call_operand.vmem [shape: f32[8,8], index: 1, kind: input, shape index: {}]   ;;  %s1179_s2 = inlined_call_operand.vmem [shape: f32[8,1], index: 2, kind: input, shape index: {}]   ;;  %s1180_s3 = inlined_call_operand.vmem [shape: f32[8,72], index: 3, kind: input, shape index: {}]   ;;  %s1181_s4 = inlined_call_operand.vmem [shape: f32[8,1], index: 4, kind: input, shape index: {}]   ;;  %s1182_s5 = inlined_call_operand.hbm [shape: f32[2,8,256], index: 5, kind: output, shape index: {}]  }
   0x1   :  { %12 = vsyncpa [#allocation3 + $0x1], 0 }
   0x2   :  { %13 = vsyncpa [#allocation4], 0 }
   0x3   :  { %15 = vsyncpa [#allocation4 + $0x1], 0  ;;  %s924_s18 = smov 0   ;;  %s926_s19 = smov 0  }
   0x4   :  { %s928_s20 = smov 0   ;;  %s930_s21 = smov 0  }
   0x5 LB: > { %s945_s22 = sadd.s32 4294967295, %s879_s21   ;;  %s633_s23 = sadd.s32 4294967294, %s879_s21   ;;  %s879_s21 = sphi %s930_s21, %s1207_s21   ;;  %s875_s20 = sphi %s928_s20, %s1206_s20   ;;  %s871_s19 = sphi %s926_s19, %s1205_s19   ;;  %s867_s18 = sphi %s924_s18, %s1204_s18  }
   0x6   : > { %s949_s24 = sadd.s32 1, %s879_s21   ;;  %s28_s25 = sadd.s32 1, %s875_s20 }
   0x7   : > { %s25_s26 = ssub.s32 %s879_s21, %s949_s24  ;;  %p35_p0 = scmp.ne.s32.totalorder %s875_s20, %s871_s19 }
   0x8   : > { %p26_p1 = scmp.eq.s32.totalorder %s25_s26, 0  ;;  %p36_p2 = scmp.eq.s32.totalorder %s879_s21, 0 }
   0x9   : > { %p41_p3 = scmp.ne.s32.totalorder %s871_s19, %s867_s18  ;;  %p42_p4 = scmp.eq.s32.totalorder %s945_s22, 0 }
   0xa   : > { %s961_s27 = scalar_select %p26_p1, %s875_s20, %s28_s25  }
   0xb   : > { %p963_p5 = por %p36_p2, %p35_p0  ;;  %p967_p6 = por %p42_p4, %p41_p3 }
   0xc   : > { %p149_p7 = scmp.eq.s32.totalorder %s945_s22, 1  ;;  %p155_p8 = scmp.eq.s32.totalorder %s633_s23, 1 }
   0xd   : > { %p702_p10 = scmp.lt.s32.totalorder %s879_s21, 2  ;;  %s187_s7 = sand.u32 1, %s875_s20  }
   0xe   : > { %p974_p11 = por %p149_p7, %p35_p0  ;;  %p978_p12 = por %p155_p8, %p41_p3 }
   0xf   : > { %s664_s8 = sshll.u32 %s879_s21, 8  ;;  %s636_s9 = sshll.u32 %s187_s7, 4 }
  0x10   : > { %s1186_s30 = scalar_select %p974_p11, 1, 0 }
  0x11   : > { %s1187_s6 = scalar_select %p978_p12, 1, 0 }
  0x12   : > { %s987_s12 = scalar_lea.hbm %s1177_s0, %s664_s8  ;;  %s191_s13 = scalar_lea.vmem [#allocation2], %s636_s9 }
  0x13   : > { %s199_s14 = sshll.u32 %s191_s13, 4  ;;  %p991_p13 = pnand %p702_p10, %p963_p5  ;;  %s995_s14 = int_to_ptr.vmem [resolvable:$true] %s199_s14 }
  0x14   : > { %s188_s16 = scalar_lea.sflag [#allocation3], %s187_s7  ;;  %s783_s17 = scalar_lea.hbm %s987_s12, 256 }
  0x15   : > { %p784_p2 = scmp.ne.s32.totalorder %s987_s12, %s783_s17  ;;  %p785_p3 = pneg %p991_p13 }
  0x16   : > { %s788_s26 = scalar_lea.hbm %s1177_s0, 512  ;;  %p789_p5 = scmp.lt.u32.totalorder %s987_s12, %s1177_s0 }
  0x17   : > { %p786_p4 = pnand %p785_p3, %p784_p2  ;;  %p790_p8 = scmp.lt.u32.totalorder %s788_s26, %s783_s17 }
  0x18   : > { %p792_p9 = scmp.lt.u32.totalorder %s783_s17, %s987_s12 }
  0x19   : > { %p787_p7 = pneg %p786_p4  ;;  %p791_p10 = por %p790_p8, %p789_p5 }
  0x1b   : > { %p793_p0 = por %p792_p9, %p791_p10 }
  0x1d   : > { %p794_p1 = pnand %p793_p0, %p787_p7 }
  0x1f   : > { %797 = shalt.err (!%p794_p1)
}
  0x20   : > { %s798_s7 = scalar_lea.vmem %s995_s14, 256  ;;  %s881_s9 = smov [#allocation2]  }
  0x21   : > { %p799_p2 = scmp.ne.s32.totalorder %s995_s14, %s798_s7  ;;  %s803_s10 = sshll.u32 %s881_s9, 4  ;;  %s804_s10 = int_to_ptr.vmem [resolvable:$false] %s803_s10 }
  0x22   : > { %s805_s11 = scalar_lea.vmem %s804_s10, 512  ;;  %p806_p11 = scmp.lt.s32.totalorder %s995_s14, %s804_s10 }
  0x23   : > { %p801_p4 = pnand %p799_p2, %p785_p3  ;;  %p807_p5 = scmp.lt.s32.totalorder %s805_s11, %s798_s7 }
  0x25   : > { %p802_p12 = pneg %p801_p4  ;;  %p808_p8 = por %p807_p5, %p806_p11 }
  0x27   : > { %p809_p9 = pnand %p808_p8, %p802_p12 }
  0x29   : > { %812 = shalt.err (!%p809_p9)
}
  0x2a   : > { %697 = dma.hbm_to_vmem [thread:$0]  (!%p991_p13), %s987_s12, 256, %s995_s14, %s188_s16  }
  0x2b   : > { %p1189_p0 = scmp.lt.s32.totalorder %s879_s21, 3  ;;  %p1190_p1 = scmp.ge.s32.totalorder %s879_s21, 1 }
  0x2d   : > { %p205_p3 = pnand %p1190_p1, %p1189_p0 }
  0x2e   : > { %s1029_s13 = sand.u32 (!%p205_p3), 1, %s871_s19  }
  0x2f   : > { %208 = sbr.rel (%p205_p3) target bundleno = 665 (0x299), region = 40  ;;  %s640_s17 = sshll.u32 (!%p205_p3), %s1029_s13, 4 }
  0x30   : > { %s211_s23 = scalar_lea.sflag (!%p205_p3), [#allocation3], %s1029_s13  ;;  %s214_s15 = scalar_lea.vmem (!%p205_p3), [#allocation2], %s640_s17 }
  0x36   : > { %858 = dma.done.wait (%p967_p6), %s211_s23, 256  }
  0x37   : > { %860 = vsyncadd (%p967_p6), %s211_s23, 4294967040  ;;  %v882_v0 = vmov 0.0   ;;  %v883_v1 = vmov 0   ;;  %v1039_v2 = vld [vmem:[%s214_s15 + $0x8] sm:$0xff]  ;;  %v1041_v3 = vld [vmem:[%s214_s15] sm:$0xff]  ;;  %vm250_vm0 = vcmask 64512   ;;  %v335_v24 = vlaneseq }
  0x38   : > { %318 = vmatprep.mubr.f32.mxu0 %v882_v0  ;;  %747 = vset.pattern.permute.xlu0 %v883_v1  ;;  %v243_v4 = vld [vmem:[%s1178_s1] sm:$0xff]  ;;  %s884_s29 = smov 16   ;;  %s885_s26 = smov 17   ;;  %vm372_vm1 = vcmask 138240   ;;  %vm383_vm3 = vcmask 130048   ;;  %vm392_vm6 = vcmask 121856  }
  0x39   : > { %527 = vmatprep.mubr.f32.mxu1 %v882_v0  ;;  %254 = vmatprep.subr.mxu0 %v1039_v2  ;;  %v244_v5 = vld [vmem:[%s1179_s2] sm:$0xff]  ;;  %s886_s28 = smov 15   ;;  %s887_s8 = smov 1   ;;  %v336_v25 = vand.u32 127, %v335_v24  ;;  %vm1072_vm5 = vmneg %vm383_vm3  ;;  %vm403_vm7 = vcmask 7168   ;;  %vm892_vm8 = vmmov 1  }
  0x3a   : > { %255 = vmatpush1.msra.mxu0 %v1041_v3  ;;  %247 = vperm.xlu0 %747, %v244_v5   ;;  %s888_s7 = smov 127   ;;  %s889_s9 = smov 113   ;;  %v453_v23 = vld [vmem:[%s1181_s4] sm:$0xff]  ;;  %vm414_vm14 = vcmask 1039360  }
  0x3b   : > { %642 = vmatmul.mubr.msk.f32.vlgmr.msra.gmra.mrb[0].mxu0 %vm250_vm0, %v243_v4  ;;  %s890_s10 = smov 112   ;;  %s891_s11 = smov 111   ;;  %v337_v26 = vadd.s32 128, %v336_v25  ;;  %v342_v28 = vand.u32 15, %v336_v25  ;;  %vm425_vm0 = vcmask 924672  }
  0x3c   : > { %s665_s16 = sshll.u32 %s945_s22, 8  ;;  %s240_s25 = scalar_lea.vmem [#allocation5], %s640_s17 }
  0x3d   : > { %v349_v27 = vand.u32 15, %v337_v26  ;;  %vm1068_vm4 = vcmp.ne.s32.totalorder %v342_v28, 0  ;;  %vm1087_vm12 = vcmp.ne.s32.totalorder %v342_v28, 15  ;;  %s549_s22 = scalar_lea.sflag [#allocation4], %s1029_s13  ;;  %p1201_p11 = scmp.ne.s32.totalorder %s1186_s30, 0 }
  0x3e   : > { %vm670_vm10 = vmpackc.low %vm1072_vm5, %vm1068_vm4 }
  0x3f   : > { %vm1064_vm2 = vcmp.ne.s32.totalorder %v349_v27, 0  ;;  %vm1083_vm11 = vcmp.ne.s32.totalorder %v349_v27, 15  ;;  %vm676_vm15 = vmpackc.low %vm1068_vm4, %vm1087_vm12 }
  0x40   : > { %vm667_vm9 = vmpackc.low %vm892_vm8, %vm1064_vm2 }
  0x41   : > { %vm673_vm13 = vmpackc.low %vm1064_vm2, %vm1083_vm11 }
  0x42   : > { %vm682_vm5 = vmpackc.low %vm1087_vm12, %vm892_vm8 }
  0xb9   : > { %v248_v6 = vpop.permute.xlu0 %247 }
 0x10e   : > { %v320_v7 = vpop.f32.mrb[0].mxu0 }
 0x10f   : > { %v321_v8 = vadd.f32 %v320_v7, %v248_v6  ;;  %v322_v9 = vpop.f32.mrb[1].mxu0 }
 0x110   : > { %v323_v10 = vadd.f32 %v322_v9, %v248_v6 }
 0x111   : > { %v325_v11 = vadd.f32 3.0, %v321_v8 }
 0x112   : > { %v326_v12 = vadd.f32 3.0, %v323_v10 }
 0x113   : > { %v327_v13 = vmax.f32 %v325_v11, 0.0 }
 0x114   : > { %v328_v14 = vmax.f32 %v326_v12, 0.0 }
 0x115   : > { %v329_v15 = vmin.f32 %v327_v13, 6.0 }
 0x116   : > { %v330_v16 = vmin.f32 %v328_v14, 6.0 }
 0x117   : > { %v331_v17 = vmul.f32 %v329_v15, %v321_v8 }
 0x118   : > { %v332_v18 = vmul.f32 %v330_v16, %v323_v10  ;;  %v452_v16 = vld [vmem:[%s1180_s3] sm:$0xff] }
 0x119   : > { %v1051_v19 = vmul.f32 0.16666667, %v331_v17 }
 0x11a   : > { %v1053_v20 = vmul.f32 0.16666667, %v332_v18 }
 0x11c   : > { %v753_v21 = vpack.i.bf16 %v1053_v20, %v1051_v19  ;;  %v768_v22 = vpack.i.bf16 %v1051_v19, %v1053_v20 }
 0x11e   : > { %754 = vrot.lane.b32.xlu1 %v753_v21, %s884_s29  ;;  %749 = vrot.lane.b32.xlu0 %v753_v21, %s885_s26  ;;  %s563_s29 = sshll.u32 %s240_s25, 4  ;;  %s1135_s29 = int_to_ptr.vmem [resolvable:$true] %s563_s29 }
 0x11f   : > { %s813_s17 = scalar_lea.vmem %s1135_s29, 256 }
 0x120   : > { %p814_p6 = scmp.ne.s32.totalorder %s1135_s29, %s813_s17 }
 0x122   : > { %759 = vrot.lane.b32.xlu1 %v753_v21, %s886_s28  ;;  %764 = vrot.lane.b32.xlu0 %v753_v21, %s887_s8  ;;  %s1133_s8 = scalar_lea.hbm %s1182_s5, %s665_s16  ;;  %p815_p12 = pnand %p814_p6, %p1201_p11 }
 0x124   : > { %p816_p13 = pneg %p815_p12 }
 0x126   : > { %769 = vrot.lane.b32.xlu1 %v768_v22, %s888_s7  ;;  %774 = vrot.lane.b32.xlu0 %v768_v22, %s889_s9  ;;  %s893_s7 = smov [#allocation5]  }
 0x127   : > { %s817_s9 = sshll.u32 %s893_s7, 4  ;;  %s818_s9 = int_to_ptr.vmem [resolvable:$false] %s817_s9 }
 0x128   : > { %p820_p7 = scmp.lt.s32.totalorder %s1135_s29, %s818_s9 }
 0x12a   : > { %779 = vrot.lane.b32.xlu1 %v753_v21, %s890_s10  ;;  %443 = vrot.lane.b32.xlu0 %v1053_v20, %s891_s11  ;;  %s819_s10 = scalar_lea.vmem %s818_s9, 512 }
 0x12b   : > { %p821_p10 = scmp.lt.s32.totalorder %s819_s10, %s813_s17 }
 0x12d   : > { %p822_p2 = por %p821_p10, %p820_p7 }
 0x12e   : > { %441 = vrot.lane.b32.xlu1 %v1051_v19, %s891_s11  ;;  %456 = vperm.xlu0 %747, %v453_v23  }
 0x12f   : > { %p823_p4 = pnand %p822_p2, %p816_p13 }
 0x190   : > { %v755_v29 = vpop.permute.xlu1 %754  ;;  %v750_v30 = vpop.permute.xlu0 %749 }
 0x191   : > { %v757_v33 = vunpack.i.h.bf16 %v755_v29  ;;  %v756_v34 = vunpack.i.l.bf16 %v755_v29  ;;  %v752_v35 = vunpack.i.h.bf16 %v750_v30  ;;  %v751_v36 = vunpack.i.l.bf16 %v750_v30 }
 0x193   : > { %v376_v38 = vsel %vm372_vm1, 0.0, %v751_v36  ;;  %v373_v39 = vsel %vm372_vm1, %v751_v36, %v752_v35  ;;  %v384_v40 = vsel %vm383_vm3, %v756_v34, %v757_v33  ;;  %vm679_vm1 = vmpackc.low %vm1083_vm11, %vm892_vm8  ;;  %vm436_vm3 = vcmask 916480  }
 0x194   : > { %v760_v41 = vpop.permute.xlu1 %759  ;;  %v765_v42 = vpop.permute.xlu0 %764  ;;  %v666_v43 = vpack.c.bf16 %v384_v40, %v373_v39  ;;  %v669_v44 = vpack.c.bf16 %v756_v34, %v376_v38 }
 0x195   : > { %v762_v47 = vunpack.i.h.bf16 %v760_v41  ;;  %v761_v48 = vunpack.i.l.bf16 %v760_v41  ;;  %v767_v49 = vunpack.i.h.bf16 %v765_v42  ;;  %v766_v50 = vunpack.i.l.bf16 %v765_v42 }
 0x196   : > { %668 = vmatprep.subr.msk.bf16.mxu1 %vm667_vm9, %v666_v43  ;;  %vm688_vm9 = vmpackc.low %vm892_vm8, %vm1068_vm4 }
 0x197   : > { %v393_v51 = vsel %vm392_vm6, %v761_v48, %v762_v47  ;;  %v396_v52 = vsel %vm392_vm6, 0.0, %v761_v48  ;;  %v404_v53 = vsel %vm403_vm7, %v766_v50, %v767_v49  ;;  %v407_v54 = vsel %vm403_vm7, 0.0, %v766_v50  ;;  %671 = vmatpush1.bf16.msk.msra.mxu1 %vm670_vm10, %v669_v44  ;;  %vm685_vm6 = vmpackc.low %vm436_vm3, %vm1064_vm2 }
 0x198   : > { %v672_v55 = vpack.c.bf16 %v404_v53, %v393_v51  ;;  %v675_v56 = vpack.c.bf16 %v407_v54, %v396_v52  ;;  %v770_v57 = vpop.permute.xlu1 %769  ;;  %v775_v58 = vpop.permute.xlu0 %774  ;;  %vm445_vm7 = vcmask 908288   ;;  %vm459_vm2 = vcmask 588800  }
 0x199   : > { %v772_v59 = vunpack.i.h.bf16 %v770_v57  ;;  %v771_v60 = vunpack.i.l.bf16 %v770_v57  ;;  %v776_v61 = vunpack.i.l.bf16 %v775_v58  ;;  %v777_v0 = vunpack.i.h.bf16 %v775_v58 }
 0x19a   : > { %674 = vmatprep.subr.msk.bf16.mxu1 %vm673_vm13, %v672_v55 }
 0x19b   : > { %v415_v62 = vsel %vm414_vm14, %v772_v59, %v771_v60  ;;  %v418_v63 = vsel %vm414_vm14, %v771_v60, 0.0  ;;  %677 = vmatpush1.bf16.msk.msra.mxu1 %vm676_vm15, %v675_v56  ;;  %v429_v8 = vsel %vm425_vm0, %v776_v61, 0.0  ;;  %v426_v9 = vsel %vm425_vm0, %v777_v0, %v776_v61 }
 0x19c   : > { %v678_v1 = vpack.c.bf16 %v418_v63, %v1053_v20  ;;  %v681_v4 = vpack.c.bf16 %v415_v62, %v1051_v19  ;;  %v780_v5 = vpop.permute.xlu1 %779  ;;  %v444_v12 = vpop.permute.xlu0 %443 }
 0x19d   : > { %v782_v6 = vunpack.i.h.bf16 %v780_v5  ;;  %v781_v7 = vunpack.i.l.bf16 %v780_v5  ;;  %v449_v14 = vsel %vm445_vm7, %v444_v12, 0.0 }
 0x19e   : > { %680 = vmatprep.subr.msk.bf16.mxu1 %vm679_vm1, %v678_v1 }
 0x19f   : > { %v684_v10 = vpack.c.bf16 %v782_v6, %v429_v8  ;;  %683 = vmatpush1.bf16.msk.msra.mxu1 %vm682_vm5, %v681_v4  ;;  %v437_v11 = vsel %vm436_vm3, %v781_v7, %v782_v6 }
 0x1a0   : > { %v687_v13 = vpack.c.bf16 %v437_v11, %v426_v9  ;;  %v442_v15 = vpop.permute.xlu1 %441 }
 0x1a1   : > { %686 = vmatprep.subr.msk.bf16.mxu1 %vm685_vm6, %v684_v10  ;;  %v446_v17 = vsel %vm445_vm7, %v442_v15, %v444_v12 }
 0x1a3   : > { %689 = vmatpush1.bf16.msk.msra.mxu1 %vm688_vm9, %v687_v13 }
 0x1a4   : > { %656 = vmatprep.subr.msk.mxu1 %vm1083_vm11, %v449_v14 }
 0x1a7   : > { %657 = vmatpush1.msk.msra.mxu1 %vm1087_vm12, %v446_v17 }
 0x1a8   : > { %658 = vmatmul.mubr.msk.f32.vlgmr.msra.gmra.mrb[0].mxu1 %vm459_vm2, %v452_v16 }
 0x1ad   : > { %v457_v18 = vpop.permute.xlu0 %456 }
 0x27b   : > { %v529_v19 = vpop.f32.mrb[0].mxu1 }
 0x27c   : > { %v530_v20 = vadd.f32 %v529_v19, %v457_v18  ;;  %v531_v21 = vpop.f32.mrb[1].mxu1 }
 0x27d   : > { %v532_v22 = vadd.f32 %v531_v21, %v457_v18 }
 0x27e   : > { %v534_v23 = vadd.f32 3.0, %v530_v20 }
 0x27f   : > { %v535_v24 = vadd.f32 3.0, %v532_v22 }
 0x280   : > { %v536_v25 = vmax.f32 %v534_v23, 0.0 }
 0x281   : > { %v537_v26 = vmax.f32 %v535_v24, 0.0 }
 0x282   : > { %v538_v27 = vmin.f32 %v536_v25, 6.0 }
 0x283   : > { %v539_v28 = vmin.f32 %v537_v26, 6.0 }
 0x284   : > { %v540_v29 = vmul.f32 %v538_v27, %v530_v20 }
 0x285   : > { %v541_v30 = vmul.f32 %v539_v28, %v532_v22 }
 0x286   : > { %v542_v31 = vmul.f32 0.16666667, %v540_v29 }
 0x287   : > { %v543_v32 = vmul.f32 0.16666667, %v541_v30 }
 0x288   : > { %v544_v33 = vadd.f32 %v542_v31, %v1041_v3 }
 0x289   : > { %v545_v34 = vadd.f32 %v543_v32, %v1039_v2 }
 0x28a   : > { %546 = vst [vmem:[%s240_s25] sm:$0xff] %v544_v33 }
 0x28b   : > { %547 = vst [vmem:[%s240_s25 + $0x8] sm:$0xff] %v545_v34 }
 0x28c   : > { %826 = shalt.err (!%p823_p4)
}
 0x28d   : > { %s827_s13 = scalar_lea.hbm %s1133_s8, 256  ;;  %s831_s15 = scalar_lea.hbm %s1182_s5, 512 }
 0x28e   : > { %p828_p5 = scmp.ne.s32.totalorder %s1133_s8, %s827_s13  ;;  %p832_p0 = scmp.lt.u32.totalorder %s1133_s8, %s1182_s5 }
 0x28f   : > { %p833_p1 = scmp.lt.u32.totalorder %s831_s15, %s827_s13  ;;  %p835_p6 = scmp.lt.u32.totalorder %s827_s13, %s1133_s8 }
 0x290   : > { %p829_p8 = pnand %p828_p5, %p1201_p11 }
 0x291   : > { %p834_p3 = por %p833_p1, %p832_p0 }
 0x292   : > { %p830_p9 = pneg %p829_p8 }
 0x293   : > { %p836_p12 = por %p835_p6, %p834_p3 }
 0x295   : > { %p837_p13 = pnand %p836_p12, %p830_p9 }
 0x297   : > { %840 = shalt.err (!%p837_p13)
}
 0x298   : > { %692 = dma.vmem_to_hbm [thread:$0]  (%p1201_p11), %s1135_s29, 256, %s1133_s8, %s549_s22  }
 0x299 PF: > { %s575_s16 = sand.u32 1, %s867_s18   ;;  %p1202_p7 = scmp.ne.s32.totalorder %s1187_s6, 0 }
 0x29a   : > { %p1203_p10 = scmp.ge.s32.totalorder %s879_s21, 2  ;;  %s576_s25 = scalar_lea.sflag [#allocation4], %s575_s16 }
 0x29c   : > { %p699_p2 = pnand %p1203_p10, %p1202_p7 }
 0x29e   : > { %862 = dma.done.wait (!%p699_p2), %s576_s25, 256  }
 0x29f   : > { %864 = vsyncadd (!%p699_p2), %s576_s25, 4294967040  ;;  %p18_p4 = scmp.ge.s32.totalorder %s949_s24, 4   ;;  %s1204_s18 = smov %s871_s19 }
 0x2a0   : > { %s1205_s19 = smov %s875_s20  ;;  %s1206_s20 = smov %s961_s27 }
 0x2a1   : > { %s1207_s21 = smov %s949_s24  ;;  %20 = sbr.rel (!%p18_p4) target bundleno = 5 (0x5), region = 85 }
 0x2a8   :  { %581 = vsyncpa [#allocation3], 1 }
 0x2a9   :  { %583 = vsyncpa [#allocation3 + $0x1], 1 }
 0x2aa   :  { %584 = vsyncpa [#allocation4], 1 }
 0x2ab   :  { %586 = vsyncpa [#allocation4 + $0x1], 1 }

</bundles_post_ra>
